<compile_context>
chip_gen: v6e
topology: v6e:2x2x1
jax: 0.10.0
libtpu: 0.0.40
codegen_flags: <defaults>
</compile_context>

<pallas_src>
import functools

import jax
import jax.numpy as jnp
from jax.experimental import pallas as pl
from jax.experimental.pallas import tpu as pltpu

GAMMA = 2          # SelfLoss(gamma=2)
L1_NUM = 5         # SelfLoss(l1_num=5)
THRESHOLD = 1.5    # hardcoded in forward()


def _selfloss_kernel(logits_ref, y_ref, w_ref, xs_ref, out_ref, *,
                     gamma, l1_num, xs_dim3):
    # logits_ref: (B, C, HW) f32 ; y_ref: (B, HW) i32 ; w_ref: (B, HW) f32
    # xs_ref: (B*C, HW) f32 ; out_ref: (1, 1) f32 in SMEM
    _, c, _ = logits_ref.shape

    y = y_ref[...]                     # (B, HW) int32, -1 == ignore_index
    w = w_ref[...]                     # (B, HW) f32

    # Load each class plane once: lane-dense (B, HW) slabs.
    cls = [logits_ref[:, k, :] for k in range(c)]

    # --- cross entropy (ignore_index=-1, reduction='none'), C unrolled on VPU ---
    m = cls[0]
    for k in range(1, c):
        m = jnp.maximum(m, cls[k])                       # running max over classes

    # Single EUP pass per class: exp(cls[k]-m) feeds both the softmax
    # denominator and the target-probability select (no one-hot gather,
    # no second exp(-ce)).
    e0 = jnp.exp(cls[0] - m)
    s = e0
    tgt = jnp.where(y == 0, cls[0], jnp.zeros_like(cls[0]))
    p_tgt = jnp.where(y == 0, e0, jnp.zeros_like(e0))
    for k in range(1, c):
        ek = jnp.exp(cls[k] - m)
        s = s + ek
        tgt = jnp.where(y == k, cls[k], tgt)             # target logit select
        p_tgt = jnp.where(y == k, ek, p_tgt)             # target exp select
    lse = m + jnp.log(s)

    valid = y != -1
    ce = jnp.where(valid, lse - tgt, 0.0)                # (B, HW)

    # --- focal loss: pt = softmax prob of target class; (1 - pt)**gamma as
    # explicit multiplies (gamma is a static int). Ignored pixels have ce == 0
    # (and p_tgt == 0), so their focal contribution is exactly 0.
    pt = p_tgt / s
    d = 1.0 - pt
    if gamma <= 0:
        fw = jnp.ones_like(d)
    else:
        fw = d
        for _ in range(gamma - 1):
            fw = fw * d
    focal = fw * ce

    num = jnp.sum(focal * w)
    den = jnp.sum(w)

    # --- L1 term and count constraint on x_s ---
    xs = xs_ref[...]                                     # (B*C, HW)
    l1loss = jnp.sum(jnp.abs(xs)) / jnp.float32(xs_dim3)
    large = jnp.sum((xs > THRESHOLD).astype(jnp.float32))
    count_constraint = jnp.maximum(jnp.float32(l1_num) - large, 0.0)

    out_ref[0, 0] = num / den + 2.0 * l1loss + count_constraint


def self_loss(y_pre, x_s, y, w, *, gamma=GAMMA, l1_num=L1_NUM):
    """y_pre: (B,C,H,W) f32 logits; x_s: (B,C,H,W) f32; y: (B,H,W) int32 labels
    (-1 = ignore); w: (B,H,W) f32 per-pixel weights. Returns scalar f32."""
    b, c, h, wd = y_pre.shape
    hw = h * wd

    # Pure reshapes only: no transpose, no dtype casts (inputs already f32/int32).
    logits3 = y_pre.reshape(b, c, hw)                                  # (B, C, HW)
    y2 = y.reshape(b, hw)                                              # (B, HW)
    w2 = w.reshape(b, hw)                                              # (B, HW)
    xs2 = x_s.reshape(x_s.shape[0] * x_s.shape[1],
                      x_s.shape[2] * x_s.shape[3])                     # (B*C, HW)

    kern = functools.partial(_selfloss_kernel, gamma=int(gamma),
                             l1_num=l1_num, xs_dim3=x_s.shape[3])

    # Tiny problem: gridless, one TensorCore, everything resident in VMEM.
    # TODO(synk): for real-resolution inputs add a 1-D row-tiled grid with
    # scalar accumulators + pl.when finalize (sized for v7x 64 MiB VMEM /
    # v5e 16 MiB scoped default).
    out = pl.pallas_call(
        kern,
        out_shape=jax.ShapeDtypeStruct((1, 1), jnp.float32),
        in_specs=[pl.BlockSpec(memory_space=pltpu.MemorySpace.VMEM)] * 4,
        out_specs=pl.BlockSpec(memory_space=pltpu.MemorySpace.SMEM),
    )(logits3, y2, w2, xs2)
    return out[0, 0]


def _reference_loss(y_pre, x_s, y, w, gamma=GAMMA, l1_num=L1_NUM):
    """Pure-JAX mirror of the PyTorch forward for verification."""
    logits = jnp.transpose(y_pre, (0, 2, 3, 1))                        # B,H,W,C
    lse = jax.scipy.special.logsumexp(logits, axis=-1)
    tgt = jnp.take_along_axis(
        logits, jnp.maximum(y, 0)[..., None], axis=-1)[..., 0]
    valid = y != -1
    ce = jnp.where(valid, lse - tgt, 0.0)
    pt = jnp.exp(-ce)
    focal = (1.0 - pt) ** gamma * ce
    l1loss = jnp.sum(jnp.abs(x_s)) / x_s.shape[3]
    cnt = jnp.sum(x_s > THRESHOLD)
    cc = jnp.maximum(jnp.float32(l1_num) - cnt.astype(jnp.float32), 0.0)
    return jnp.sum(focal * w) / jnp.sum(w) + 2.0 * l1loss + cc


if __name__ == "__main__":
    key = jax.random.PRNGKey(0)
    k1, k2, k3, k4, k5 = jax.random.split(key, 5)

    B, C, H, W = 2, 4, 16, 16          # class_num = C = 4
    y_pre = jax.random.normal(k1, (B, C, H, W), jnp.float32)
    x_s = jax.random.normal(k2, (B, C, H, W), jnp.float32)
    y = jax.random.randint(k3, (B, H, W), 0, C, jnp.int32)
    # sprinkle a few ignore_index entries
    ignore_mask = jax.random.uniform(k4, (B, H, W)) < 0.1
    y = jnp.where(ignore_mask, -1, y).astype(jnp.int32)
    w = jax.random.uniform(k5, (B, H, W), jnp.float32, 0.1, 1.0)

    out = jax.block_until_ready(self_loss(y_pre, x_s, y, w))
    ref = jax.block_until_ready(_reference_loss(y_pre, x_s, y, w))

    assert jnp.allclose(out, ref, rtol=1e-5, atol=1e-5), (out, ref)
    print("KERNEL_OK")
</pallas_src>

<mosaic_0001>
module attributes {stable_mosaic.version = 11 : i64} {
  func.func @_selfloss_kernel(%arg0: memref<2x4x256xf32, #tpu.memory_space<vmem>>, %arg1: memref<2x256xi32, #tpu.memory_space<vmem>>, %arg2: memref<2x256xf32, #tpu.memory_space<vmem>>, %arg3: memref<8x256xf32, #tpu.memory_space<vmem>>, %arg4: memref<1x1xf32, #tpu.memory_space<smem>>) attributes {dimension_semantics = [], scalar_prefetch = 0 : i64, scratch_operands = 0 : i64, tpu.core_type = #tpu.core_type<tc>} {
    %c0 = arith.constant 0 : index
    %c0_0 = arith.constant 0 : index
    %0 = vector.load %arg1[%c0, %c0_0] : memref<2x256xi32, #tpu.memory_space<vmem>>, vector<2x256xi32>
    %c0_1 = arith.constant 0 : index
    %c0_2 = arith.constant 0 : index
    %1 = vector.load %arg2[%c0_1, %c0_2] : memref<2x256xf32, #tpu.memory_space<vmem>>, vector<2x256xf32>
    %c0_3 = arith.constant 0 : index
    %c0_4 = arith.constant 0 : index
    %c0_5 = arith.constant 0 : index
    %2 = vector.load %arg0[%c0_3, %c0_4, %c0_5] : memref<2x4x256xf32, #tpu.memory_space<vmem>>, vector<2x1x256xf32>
    %3 = vector.shape_cast %2 : vector<2x1x256xf32> to vector<2x256xf32>
    %c0_6 = arith.constant 0 : index
    %c1 = arith.constant 1 : index
    %c0_7 = arith.constant 0 : index
    %4 = vector.load %arg0[%c0_6, %c1, %c0_7] : memref<2x4x256xf32, #tpu.memory_space<vmem>>, vector<2x1x256xf32>
    %5 = vector.shape_cast %4 : vector<2x1x256xf32> to vector<2x256xf32>
    %c0_8 = arith.constant 0 : index
    %c2 = arith.constant 2 : index
    %c0_9 = arith.constant 0 : index
    %6 = vector.load %arg0[%c0_8, %c2, %c0_9] : memref<2x4x256xf32, #tpu.memory_space<vmem>>, vector<2x1x256xf32>
    %7 = vector.shape_cast %6 : vector<2x1x256xf32> to vector<2x256xf32>
    %c0_10 = arith.constant 0 : index
    %c3 = arith.constant 3 : index
    %c0_11 = arith.constant 0 : index
    %8 = vector.load %arg0[%c0_10, %c3, %c0_11] : memref<2x4x256xf32, #tpu.memory_space<vmem>>, vector<2x1x256xf32>
    %9 = vector.shape_cast %8 : vector<2x1x256xf32> to vector<2x256xf32>
    %10 = arith.maximumf %3, %5 : vector<2x256xf32>
    %11 = arith.maximumf %10, %7 : vector<2x256xf32>
    %12 = arith.maximumf %11, %9 : vector<2x256xf32>
    %13 = arith.subf %3, %12 : vector<2x256xf32>
    %14 = math.exp %13 : vector<2x256xf32>
    %c0_i32 = arith.constant 0 : i32
    %15 = vector.broadcast %c0_i32 : i32 to vector<2x256xi32>
    %16 = arith.cmpi eq, %0, %15 : vector<2x256xi32>
    %cst = arith.constant 0.000000e+00 : f32
    %17 = vector.broadcast %cst : f32 to vector<2x256xf32>
    %18 = arith.select %16, %3, %17 : vector<2x256xi1>, vector<2x256xf32>
    %c0_i32_12 = arith.constant 0 : i32
    %19 = vector.broadcast %c0_i32_12 : i32 to vector<2x256xi32>
    %20 = arith.cmpi eq, %0, %19 : vector<2x256xi32>
    %cst_13 = arith.constant 0.000000e+00 : f32
    %21 = vector.broadcast %cst_13 : f32 to vector<2x256xf32>
    %22 = arith.select %20, %14, %21 : vector<2x256xi1>, vector<2x256xf32>
    %23 = arith.subf %5, %12 : vector<2x256xf32>
    %24 = math.exp %23 : vector<2x256xf32>
    %25 = arith.addf %14, %24 : vector<2x256xf32>
    %c1_i32 = arith.constant 1 : i32
    %26 = vector.broadcast %c1_i32 : i32 to vector<2x256xi32>
    %27 = arith.cmpi eq, %0, %26 : vector<2x256xi32>
    %28 = arith.select %27, %5, %18 : vector<2x256xi1>, vector<2x256xf32>
    %c1_i32_14 = arith.constant 1 : i32
    %29 = vector.broadcast %c1_i32_14 : i32 to vector<2x256xi32>
    %30 = arith.cmpi eq, %0, %29 : vector<2x256xi32>
    %31 = arith.select %30, %24, %22 : vector<2x256xi1>, vector<2x256xf32>
    %32 = arith.subf %7, %12 : vector<2x256xf32>
    %33 = math.exp %32 : vector<2x256xf32>
    %34 = arith.addf %25, %33 : vector<2x256xf32>
    %c2_i32 = arith.constant 2 : i32
    %35 = vector.broadcast %c2_i32 : i32 to vector<2x256xi32>
    %36 = arith.cmpi eq, %0, %35 : vector<2x256xi32>
    %37 = arith.select %36, %7, %28 : vector<2x256xi1>, vector<2x256xf32>
    %c2_i32_15 = arith.constant 2 : i32
    %38 = vector.broadcast %c2_i32_15 : i32 to vector<2x256xi32>
    %39 = arith.cmpi eq, %0, %38 : vector<2x256xi32>
    %40 = arith.select %39, %33, %31 : vector<2x256xi1>, vector<2x256xf32>
    %41 = arith.subf %9, %12 : vector<2x256xf32>
    %42 = math.exp %41 : vector<2x256xf32>
    %43 = arith.addf %34, %42 : vector<2x256xf32>
    %c3_i32 = arith.constant 3 : i32
    %44 = vector.broadcast %c3_i32 : i32 to vector<2x256xi32>
    %45 = arith.cmpi eq, %0, %44 : vector<2x256xi32>
    %46 = arith.select %45, %9, %37 : vector<2x256xi1>, vector<2x256xf32>
    %c3_i32_16 = arith.constant 3 : i32
    %47 = vector.broadcast %c3_i32_16 : i32 to vector<2x256xi32>
    %48 = arith.cmpi eq, %0, %47 : vector<2x256xi32>
    %49 = arith.select %48, %42, %40 : vector<2x256xi1>, vector<2x256xf32>
    %50 = math.log %43 : vector<2x256xf32>
    %51 = arith.addf %12, %50 : vector<2x256xf32>
    %c-1_i32 = arith.constant -1 : i32
    %52 = vector.broadcast %c-1_i32 : i32 to vector<2x256xi32>
    %53 = arith.cmpi ne, %0, %52 : vector<2x256xi32>
    %54 = arith.subf %51, %46 : vector<2x256xf32>
    %cst_17 = arith.constant 0.000000e+00 : f32
    %55 = vector.broadcast %cst_17 : f32 to vector<2x256xf32>
    %56 = arith.select %53, %54, %55 : vector<2x256xi1>, vector<2x256xf32>
    %57 = arith.divf %49, %43 : vector<2x256xf32>
    %cst_18 = arith.constant 1.000000e+00 : f32
    %58 = vector.broadcast %cst_18 : f32 to vector<2x256xf32>
    %59 = arith.subf %58, %57 : vector<2x256xf32>
    %60 = arith.mulf %59, %59 : vector<2x256xf32>
    %61 = arith.mulf %60, %56 : vector<2x256xf32>
    %62 = arith.mulf %61, %1 : vector<2x256xf32>
    %63 = vector.shape_cast %62 : vector<2x256xf32> to vector<1x2x256xf32>
    %cst_19 = arith.constant dense<0.000000e+00> : vector<1xf32>
    %64 = vector.multi_reduction <add>, %63, %cst_19 [1, 2] : vector<1x2x256xf32> to vector<1xf32>
    %65 = vector.shape_cast %64 : vector<1xf32> to vector<1x1x1xf32>
    %66 = vector.extract %65[0, 0, 0] : f32 from vector<1x1x1xf32>
    %67 = vector.shape_cast %1 : vector<2x256xf32> to vector<1x2x256xf32>
    %cst_20 = arith.constant dense<0.000000e+00> : vector<1xf32>
    %68 = vector.multi_reduction <add>, %67, %cst_20 [1, 2] : vector<1x2x256xf32> to vector<1xf32>
    %69 = vector.shape_cast %68 : vector<1xf32> to vector<1x1x1xf32>
    %70 = vector.extract %69[0, 0, 0] : f32 from vector<1x1x1xf32>
    %c0_21 = arith.constant 0 : index
    %c0_22 = arith.constant 0 : index
    %71 = vector.load %arg3[%c0_21, %c0_22] : memref<8x256xf32, #tpu.memory_space<vmem>>, vector<8x256xf32>
    %72 = math.absf %71 : vector<8x256xf32>
    %73 = vector.shape_cast %72 : vector<8x256xf32> to vector<1x8x256xf32>
    %cst_23 = arith.constant dense<0.000000e+00> : vector<1xf32>
    %74 = vector.multi_reduction <add>, %73, %cst_23 [1, 2] : vector<1x8x256xf32> to vector<1xf32>
    %75 = vector.shape_cast %74 : vector<1xf32> to vector<1x1x1xf32>
    %76 = vector.extract %75[0, 0, 0] : f32 from vector<1x1x1xf32>
    %cst_24 = arith.constant 1.600000e+01 : f32
    %77 = arith.divf %76, %cst_24 : f32
    %cst_25 = arith.constant 1.500000e+00 : f32
    %78 = vector.broadcast %cst_25 : f32 to vector<8x256xf32>
    %79 = arith.cmpf ogt, %71, %78 : vector<8x256xf32>
    %80 = arith.extui %79 : vector<8x256xi1> to vector<8x256xi32>
    %81 = arith.sitofp %80 : vector<8x256xi32> to vector<8x256xf32>
    %82 = vector.shape_cast %81 : vector<8x256xf32> to vector<1x8x256xf32>
    %cst_26 = arith.constant dense<0.000000e+00> : vector<1xf32>
    %83 = vector.multi_reduction <add>, %82, %cst_26 [1, 2] : vector<1x8x256xf32> to vector<1xf32>
    %84 = vector.shape_cast %83 : vector<1xf32> to vector<1x1x1xf32>
    %85 = vector.extract %84[0, 0, 0] : f32 from vector<1x1x1xf32>
    %cst_27 = arith.constant 5.000000e+00 : f32
    %86 = arith.subf %cst_27, %85 : f32
    %cst_28 = arith.constant 0.000000e+00 : f32
    %87 = arith.maximumf %86, %cst_28 : f32
    %88 = arith.divf %66, %70 : f32
    %cst_29 = arith.constant 2.000000e+00 : f32
    %89 = arith.mulf %cst_29, %77 : f32
    %90 = arith.addf %88, %89 : f32
    %91 = arith.addf %90, %87 : f32
    %c0_30 = arith.constant 0 : index
    %c0_31 = arith.constant 0 : index
    %92 = memref.load %arg4[%c0_30, %c0_31] : memref<1x1xf32, #tpu.memory_space<smem>>
    memref.store %91, %arg4[%c0_30, %c0_31] : memref<1x1xf32, #tpu.memory_space<smem>>
    return
  }
}

</mosaic_0001>

<bundles_post_ra>
// kernel: tpu_custom_call.1
= control target key start
LH: loop header
LB: loop body
LE: loop exit
PB: predicated region body
PF: predicated region fallthrough
CT: control target
= control target key end

     0   :  { %9 = vsyncpa [#allocation3], 0  ;;  %s666_s0 = inlined_call_operand.hbm [shape: f32[2,4,256], index: 0, kind: input, shape index: {}]   ;;  %s667_s1 = inlined_call_operand.hbm [shape: s32[2,256], index: 1, kind: input, shape index: {}]   ;;  %s668_s2 = inlined_call_operand.hbm [shape: f32[2,256], index: 2, kind: input, shape index: {}]   ;;  %s669_s3 = inlined_call_operand.hbm [shape: f32[8,256], index: 3, kind: input, shape index: {}]   ;;  %s670_s4 = inlined_call_operand.hbm [shape: f32[1,1], index: 4, kind: output, shape index: {}]  }
   0x1   :  { %10 = vsyncpa [#allocation6], 0 }
   0x2   :  { %11 = vsyncpa [#allocation9], 0 }
   0x3   :  { %12 = vsyncpa [#allocation4], 0  ;;  %s520_s15 = smov [#allocation5]   ;;  %s521_s17 = smov [#allocation2]  }
   0x4   :  { %s31_s16 = sshll.u32 %s520_s15, 4  ;;  %s18_s18 = sshll.u32 %s521_s17, 4  ;;  %s32_s16 = int_to_ptr.vmem [resolvable:$true] %s31_s16  ;;  %s19_s18 = int_to_ptr.vmem [resolvable:$true] %s18_s18 }
   0x5   :  { %s432_s19 = scalar_lea.vmem %s32_s16, 64  ;;  %p437_p1 = scmp.lt.s32.totalorder %s32_s16, %s32_s16 }
   0x6   :  { %p433_p0 = scmp.ne.s32.totalorder %s32_s16, %s432_s19  ;;  %p438_p2 = scmp.lt.s32.totalorder %s432_s19, %s432_s19 }
   0x8   :  { %p439_p3 = por %p438_p2, %p437_p1 }
   0xa   :  { %p440_p4 = pnand %p439_p3, %p433_p0 }
   0xc   :  { %443 = shalt.err (!%p440_p4)
}
   0xd   :  { %34 = dma.hbm_to_vmem [thread:$0]  %s667_s1, 64, %s32_s16, [#allocation6]  }
   0xe   :  { %s452_s22 = scalar_lea.vmem %s19_s18, 256  ;;  %p457_p6 = scmp.lt.s32.totalorder %s19_s18, %s19_s18 }
   0xf   :  { %p453_p5 = scmp.ne.s32.totalorder %s19_s18, %s452_s22  ;;  %p458_p7 = scmp.lt.s32.totalorder %s452_s22, %s452_s22 }
  0x11   :  { %p459_p8 = por %p458_p7, %p457_p6 }
  0x13   :  { %p460_p9 = pnand %p459_p8, %p453_p5 }
  0x15   :  { %463 = shalt.err (!%p460_p9)
}
  0x16   :  { %s522_s23 = smov 128   ;;  %s523_s24 = smov 8  }
  0x17   :  { %24 = dma.hbm_to_vmem [thread:$0]  %s666_s0, 256, %s19_s18, [#allocation3], %s522_s23, %s522_s23, %s523_s24  }
  0x18   :  { %s524_s27 = smov [#allocation7]   ;;  %s525_s29 = smov [#allocation8]  }
  0x19   :  { %s41_s28 = sshll.u32 %s524_s27, 4  ;;  %s51_s30 = sshll.u32 %s525_s29, 4  ;;  %s42_s28 = int_to_ptr.vmem [resolvable:$true] %s41_s28  ;;  %s52_s30 = int_to_ptr.vmem [resolvable:$true] %s51_s30 }
  0x1a   :  { %s472_s1 = scalar_lea.vmem %s42_s28, 64  ;;  %p477_p11 = scmp.lt.s32.totalorder %s42_s28, %s42_s28 }
  0x1b   :  { %p473_p10 = scmp.ne.s32.totalorder %s42_s28, %s472_s1  ;;  %p478_p12 = scmp.lt.s32.totalorder %s472_s1, %s472_s1 }
  0x1d   :  { %p479_p13 = por %p478_p12, %p477_p11 }
  0x1f   :  { %p480_p0 = pnand %p479_p13, %p473_p10 }
  0x21   :  { %483 = shalt.err (!%p480_p0)
}
  0x22   :  { %44 = dma.hbm_to_vmem [thread:$0]  %s668_s2, 64, %s42_s28, [#allocation6]  }
  0x23   :  { %s492_s7 = scalar_lea.vmem %s52_s30, 256  ;;  %p497_p2 = scmp.lt.s32.totalorder %s52_s30, %s52_s30 }
  0x24   :  { %p493_p1 = scmp.ne.s32.totalorder %s52_s30, %s492_s7  ;;  %p498_p3 = scmp.lt.s32.totalorder %s492_s7, %s492_s7 }
  0x26   :  { %p499_p4 = por %p498_p3, %p497_p2 }
  0x28   :  { %p500_p5 = pnand %p499_p4, %p493_p1 }
  0x2a   :  { %503 = shalt.err (!%p500_p5)
}
  0x2b   :  { %54 = dma.hbm_to_vmem [thread:$0]  %s669_s3, 256, %s52_s30, [#allocation9]  }
  0x2c   :  { %512 = dma.done.wait [#allocation3], 256  }
  0x2d   :  { %513 = vsyncadd [#allocation3], 4294967040 }
  0x2e   :  { %514 = dma.done.wait [#allocation6], 128  }
  0x2f   :  { %515 = vsyncadd [#allocation6], 4294967168 }
  0x30   :  { %516 = dma.done.wait [#allocation9], 256  }
  0x31   :  { %517 = vsyncadd [#allocation9], 4294967040  ;;  %v569_v0 = vld [vmem:[#allocation2] ss:$4 sm:$0x3]  ;;  %v316_v21 = vld [vmem:[#allocation8] sm:$0xff]  ;;  %v103_v41 = vlaneseq }
  0x32   :  { %v571_v1 = vld [vmem:[#allocation2 + $0x8] ss:$4 sm:$0x3]  ;;  %v573_v2 = vld [vmem:[#allocation2 + $0x1] ss:$4 sm:$0x3] }
  0x33   :  { %v575_v3 = vld [vmem:[#allocation2 + $0x9] ss:$4 sm:$0x3]  ;;  %v577_v4 = vld [vmem:[#allocation2 + $0x2] ss:$4 sm:$0x3]  ;;  %v84_v6 = vmax.f32 %v569_v0, %v573_v2  ;;  %v99_v45 = vcombine.low %v569_v0, %v571_v1 }
  0x34   :  { %v579_v5 = vld [vmem:[#allocation2 + $0xa] ss:$4 sm:$0x3]  ;;  %v85_v7 = vmax.f32 %v571_v1, %v575_v3  ;;  %v585_v8 = vld [vmem:[#allocation2 + $0x3] ss:$4 sm:$0x3]  ;;  %v132_v52 = vcombine.low %v573_v2, %v575_v3 }
  0x35   :  { %v587_v9 = vld [vmem:[#allocation2 + $0xb] ss:$4 sm:$0x3]  ;;  %v86_v10 = vmax.f32 %v84_v6, %v577_v4  ;;  %v317_v22 = vld [vmem:[#allocation8 + $0x8] sm:$0xff]  ;;  %v318_v31 = vand.u32 2147483647, %v316_v21  ;;  %v165_v60 = vcombine.low %v577_v4, %v579_v5 }
  0x36   :  { %v87_v11 = vmax.f32 %v85_v7, %v579_v5  ;;  %v319_v32 = vand.u32 2147483647, %v317_v22  ;;  %vm333_vm0 = vcmp.gt.f32.partialorder %v316_v21, 1.5  ;;  %vm334_vm1 = vcmp.gt.f32.partialorder %v317_v22, 1.5  ;;  %v617_v48 = vld [vmem:[#allocation5] sm:$0xf] }
  0x37   :  { %v592_v12 = vmax.f32 %v86_v10, %v585_v8  ;;  %v526_v35 = vmov 0.0   ;;  %v527_v39 = vmov 1935823168   ;;  %v613_v43 = vshrl.u32 %v103_v41, 7  ;;  %s530_s17 = smov 0.0   ;;  %s531_s20 = smov [#allocation10]  }
  0x38   :  { %v595_v13 = vmax.f32 %v87_v11, %v587_v9  ;;  %v320_v34 = vadd.f32 %v319_v32, %v318_v31  ;;  %v376_v36 = vsel %vm333_vm0, 1.0, %v526_v35  ;;  %v377_v37 = vsel %vm334_vm1, 1.0, %v526_v35 }
  0x39   :  { %v90_v14 = vsub.f32 %v569_v0, %v592_v12  ;;  %v121_v16 = vsub.f32 %v573_v2, %v592_v12  ;;  %v154_v18 = vsub.f32 %v577_v4, %v592_v12  ;;  %v187_v20 = vsub.f32 %v585_v8, %v592_v12 }
  0x3a   :  { %v91_v15 = vsub.f32 %v571_v1, %v595_v13  ;;  %v122_v17 = vsub.f32 %v575_v3, %v595_v13  ;;  %v155_v19 = vsub.f32 %v579_v5, %v595_v13  ;;  %v188_v26 = vsub.f32 %v587_v9, %v595_v13  ;;  %321 = vadd.xlane.f32.xlu1 %v320_v34 }
  0x3b   :  { %v92_v23 = vmul.f32 1.442695, %v90_v14  ;;  %v123_v25 = vmul.f32 1.442695, %v121_v16  ;;  %v156_v28 = vmul.f32 1.442695, %v154_v18  ;;  %v339_v38 = vadd.f32 %v377_v37, %v376_v36 }
  0x3c   :  { %v94_v24 = vmul.f32 1.442695, %v91_v15  ;;  %v125_v27 = vmul.f32 1.442695, %v122_v17  ;;  %v158_v29 = vmul.f32 1.442695, %v155_v19  ;;  %v101_v40 = vunpack.c.l.s4 %v527_v39 }
  0x3d   :  { %400 = vpow2.f32 %v92_v23  ;;  %v189_v30 = vmul.f32 1.442695, %v187_v20  ;;  %v191_v33 = vmul.f32 1.442695, %v188_v26  ;;  %vm96_vm2 = vcmp.eq.s32.totalorder %v617_v48, 0 }
  0x3e   :  { %402 = vpow2.f32 %v94_v24  ;;  %340 = vadd.xlane.f32.xlu1 %v339_v38  ;;  %v102_v42 = vunpack.c.0.s8 %v101_v40  ;;  %v528_v0 = vmov 1966171168   ;;  %vm129_vm3 = vcmp.eq.s32.totalorder %v617_v48, 1 }
  0x3f   :  { %404 = vpow2.f32 %v123_v25  ;;  %v229_v1 = vunpack.c.l.s4 %v528_v0  ;;  %v198_v7 = vcombine.low %v585_v8, %v587_v9  ;;  %vm162_vm4 = vcmp.eq.s32.totalorder %v617_v48, 2 }
  0x40   :  { %406 = vpow2.f32 %v125_v27  ;;  %v620_v49 = vsub.s32 %v102_v42, %v613_v43  ;;  %vm195_vm5 = vcmp.eq.s32.totalorder %v617_v48, 3  ;;  %v529_v35 = vmov 1983009808  }
  0x41   :  { %408 = vpow2.f32 %v156_v28  ;;  %v230_v15 = vunpack.c.0.s8 %v229_v1  ;;  %v271_v36 = vunpack.c.l.s4 %v529_v35  ;;  %vm226_vm6 = vcmp.ne.s32.totalorder %v617_v48, 4294967295 }
  0x42   :  { %410 = vpow2.f32 %v158_v29  ;;  %v106_v54 = vrot.slane %v99_v45, %v620_v49  ;;  %v139_v62 = vrot.slane %v132_v52, %v620_v49  ;;  %v172_v10 = vrot.slane %v165_v60, %v620_v49 }
  0x43   :  { %412 = vpow2.f32 %v189_v30  ;;  %v205_v17 = vrot.slane %v198_v7, %v620_v49  ;;  %v233_v20 = vsub.s32 %v230_v15, %v613_v43  ;;  %v272_v42 = vunpack.c.0.s8 %v271_v36 }
  0x44   :  { %414 = vpow2.f32 %v191_v33  ;;  %v108_v2 = vsel %vm96_vm2, %v106_v54, 0.0  ;;  %vm280_vm7 = vcmask 1041408  }
  0x45   :  { %v141_v5 = vsel %vm129_vm3, %v139_v62, %v108_v2 }
  0x46   :  { %v174_v8 = vsel %vm162_vm4, %v172_v10, %v141_v5 }
  0x47   :  { %v207_v21 = vsel %vm195_vm5, %v205_v17, %v174_v8 }
  0x48   :  { %v234_v25 = vrot.slane %v207_v21, %v233_v20 }
  0x4a   :  { %v401_v44 = vpop.eup %400  ;;  %v235_v32 = vcombine.high %v234_v25, %v234_v25 }
  0x4b   :  { %v403_v46 = vpop.eup %402 }
  0x4c   :  { %v405_v47 = vpop.eup %404  ;;  %v111_v3 = vcombine.low %v401_v44, %v403_v46 }
  0x4d   :  { %v407_v50 = vpop.eup %406  ;;  %v127_v51 = vadd.f32 %v405_v47, %v401_v44 }
  0x4e   :  { %v409_v53 = vpop.eup %408  ;;  %v128_v55 = vadd.f32 %v407_v50, %v403_v46  ;;  %v144_v11 = vcombine.low %v405_v47, %v407_v50  ;;  %v118_v14 = vrot.slane %v111_v3, %v620_v49  ;;  %v275_v50 = vsub.s32 %v272_v42, %v613_v43 }
  0x4f   :  { %v411_v56 = vpop.eup %410  ;;  %v160_v57 = vadd.f32 %v409_v53, %v127_v51  ;;  %v68_v51 = vld [vmem:[#allocation7] sm:$0xf] }
  0x50   :  { %v413_v58 = vpop.eup %412  ;;  %v161_v59 = vadd.f32 %v411_v56, %v128_v55  ;;  %v177_v9 = vcombine.low %v409_v53, %v411_v56  ;;  %v151_v18 = vrot.slane %v144_v11, %v620_v49  ;;  %v120_v19 = vsel %vm96_vm2, %v118_v14, 0.0 }
  0x51   :  { %v415_v61 = vpop.eup %414  ;;  %v193_v63 = vadd.f32 %v413_v58, %v160_v57  ;;  %v300_v53 = vrot.slane %v68_v51, %v275_v50 }
  0x52   :  { %v194_v6 = vadd.f32 %v415_v61, %v161_v59  ;;  %v210_v22 = vcombine.low %v413_v58, %v415_v61  ;;  %v184_v23 = vrot.slane %v177_v9, %v620_v49  ;;  %v153_v24 = vsel %vm129_vm3, %v151_v18, %v120_v19 }
  0x53   :  { %416 = vlog2.f32 %v193_v63  ;;  %v301_v55 = vcombine.high %v300_v53, %v300_v53  ;;  %v304_v59 = vsel %vm280_vm7, %v300_v53, 0.0 }
  0x54   :  { %418 = vlog2.f32 %v194_v6  ;;  %v254_v4 = vcombine.low %v193_v63, %v194_v6  ;;  %v217_v26 = vrot.slane %v210_v22, %v620_v49  ;;  %v186_v28 = vsel %vm162_vm4, %v184_v23, %v153_v24 }
  0x55   :  { %v305_v60 = vsel %vm280_vm7, %v301_v55, 0.0 }
  0x56   :  { %v261_v16 = vrot.slane %v254_v4, %v620_v49  ;;  %v219_v33 = vsel %vm195_vm5, %v217_v26, %v186_v28  ;;  %v306_v48 = vadd.f32 %v305_v60, %v304_v59 }
  0x58   :  { %420 = vrcp.f32 %v261_v16 }
  0x60   :  { %v417_v27 = vpop.eup %416 }
  0x61   :  { %v419_v29 = vpop.eup %418  ;;  %v221_v30 = vmul.f32 0.6931472, %v417_v27 }
  0x62   :  { %v223_v31 = vmul.f32 0.6931472, %v419_v29 }
  0x63   :  { %v224_v34 = vadd.f32 %v221_v30, %v592_v12 }
  0x64   :  { %v225_v37 = vadd.f32 %v223_v31, %v595_v13 }
  0x65   :  { %v421_v38 = vpop.eup %420  ;;  %v238_v39 = vsub.f32 %v224_v34, %v234_v25 }
  0x66   :  { %v239_v40 = vsub.f32 %v225_v37, %v235_v32  ;;  %v264_v41 = vmul.f32 %v421_v38, %v219_v33 }
  0x68   :  { %v242_v44 = vcombine.low %v238_v39, %v239_v40  ;;  %v265_v45 = vsub.f32 1.0, %v264_v41 }
  0x6a   :  { %v249_v46 = vrot.slane %v242_v44, %v620_v49  ;;  %v266_v47 = vmul.f32 %v265_v45, %v265_v45 }
  0x6c   :  { %v251_v12 = vsel %vm226_vm6, %v249_v46, 0.0 }
  0x6d   :  { %v267_v52 = vmul.f32 %v266_v47, %v251_v12 }
  0x6f   :  { %v268_v54 = vmul.f32 %v267_v52, %v68_v51 }
  0x71   :  { %v276_v13 = vrot.slane %v268_v54, %v275_v50 }
  0x73   :  { %v277_v56 = vcombine.high %v276_v13, %v276_v13  ;;  %v281_v57 = vsel %vm280_vm7, %v276_v13, 0.0 }
  0x75   :  { %v282_v58 = vsel %vm280_vm7, %v277_v56, 0.0 }
  0x76   :  { %v283_v61 = vadd.f32 %v282_v58, %v281_v57 }
  0x78   :  { %284 = vadd.xlane.f32.xlu0 %v283_v61 }
  0x7c   :  { %307 = vadd.xlane.f32.xlu0 %v306_v48 }
  0xc3   :  { %v322_v49 = vpop.xlane.xlu1 %321 }
  0xc4   :  { %v323_v43 = vrot.slane %v322_v49, 4 }
  0xc6   :  { %v324_v0 = vadd.f32 %v323_v43, %v322_v49 }
  0xc7   :  { %v341_v62 = vpop.xlane.xlu1 %340 }
  0xc8   :  { %v342_v63 = vrot.slane %v341_v62, 4  ;;  %v325_v6 = vrot.slane %v324_v0, 2 }
  0xca   :  { %v343_v1 = vadd.f32 %v342_v63, %v341_v62  ;;  %v326_v14 = vadd.f32 %v325_v6, %v324_v0 }
  0xcc   :  { %v344_v10 = vrot.slane %v343_v1, 2  ;;  %v327_v18 = vrot.slane %v326_v14, 1 }
  0xce   :  { %v345_v17 = vadd.f32 %v344_v10, %v343_v1  ;;  %v328_v23 = vadd.f32 %v327_v18, %v326_v14 }
  0xd0   :  { %v346_v21 = vrot.slane %v345_v17, 1 }
  0xd2   :  { %v347_v25 = vadd.f32 %v346_v21, %v345_v17 }
 0x101   :  { %v285_v2 = vpop.xlane.xlu0 %284 }
 0x102   :  { %v286_v3 = vrot.slane %v285_v2, 4 }
 0x104   :  { %v287_v7 = vadd.f32 %v286_v3, %v285_v2 }
 0x105   :  { %v308_v4 = vpop.xlane.xlu0 %307 }
 0x106   :  { %v288_v5 = vrot.slane %v287_v7, 2  ;;  %v309_v11 = vrot.slane %v308_v4, 4 }
 0x108   :  { %v310_v15 = vadd.f32 %v309_v11, %v308_v4  ;;  %v289_v16 = vadd.f32 %v288_v5, %v287_v7 }
 0x10a   :  { %v311_v8 = vrot.slane %v310_v15, 2  ;;  %v290_v9 = vrot.slane %v289_v16, 1 }
 0x10c   :  { %v312_v19 = vadd.f32 %v311_v8, %v310_v15  ;;  %v291_v20 = vadd.f32 %v290_v9, %v289_v16 }
 0x10e   :  { %378 = vpush %v291_v20  ;;  %v313_v22 = vrot.slane %v312_v19, 1 }
 0x110   :  { %v314_v24 = vadd.f32 %v313_v22, %v312_v19 }
 0x112   :  { %380 = vpush %v314_v24 }
 0x113   :  { %382 = vpush %v328_v23 }
 0x114   :  { %384 = vpush %v347_v25 }
 0x13f   :  { %s379_s2 = spop %378 }
 0x143   :  { %s381_s3 = spop %380 }
 0x144   :  { %v351_v26 = vstv %s381_s3  ;;  %s383_s9 = spop %382 }
 0x145   :  { %422 = vrcp.f32 %v351_v26  ;;  %s332_s10 = smul.f32 0.0625, %s383_s9  ;;  %s385_s11 = spop %384 }
 0x146   :  { %s349_s12 = ssub.f32 5.0, %s385_s11 }
 0x147   :  { %s355_s13 = smul.f32 2.0, %s332_s10 }
 0x148   :  { %s350_s18 = smax.f32 %s530_s17, %s349_s12 }
 0x152   :  { %v423_v27 = vpop.eup %422 }
 0x153   :  { %386 = vpush %v423_v27 }
 0x184   :  { %s387_s14 = spop %386 }
 0x185   :  { %s354_s15 = smul.f32 %s387_s14, %s379_s2 }
 0x187   :  { %s356_s16 = sadd.f32 %s355_s13, %s354_s15 }
 0x189   :  { %s357_s19 = sadd.f32 %s356_s16, %s350_s18 }
 0x18b   :  { %359 = sst [smem:[#allocation10]] %s357_s19 }
 0x18c   :  { %367 = dma.smem_to_hbm %s531_s20, 16, %s670_s4, [#allocation4]  }
 0x18d   :  { %518 = dma.done.wait [#allocation4], 16  }
 0x18e   :  { %519 = vsyncadd [#allocation4], 4294967280 }
 0x18f   :  { %371 = sfence }
 0x190   :  { %372 = vsyncpa [#allocation3], 1 }
 0x191   :  { %373 = vsyncpa [#allocation6], 1 }
 0x192   :  { %374 = vsyncpa [#allocation9], 1 }
 0x193   :  { %375 = vsyncpa [#allocation4], 1 }

</bundles_post_ra>
